<compile_context>
chip_gen: v7x
topology: tpu7x:2x2x1
jax: 0.10.0
libtpu: 0.0.40
codegen_flags: <defaults>
</compile_context>

<pallas_src>
import math

import jax
import jax.numpy as jnp
from jax import lax
from jax.experimental import pallas as pl
from jax.experimental.pallas import tpu as pltpu


def _masked_lm_kernel(x_ref, wd_ref, bd_ref, gamma_ref, beta_ref,
                      emb_ref, vbias_ref, out_ref, h_ref):
    # x_ref:     (tm, H)   row tile of flattened hidden states (compute dtype)
    # wd_ref:    (H, H)    dense weight in native nn.Linear (out, in) layout
    # bd_ref:    (1, H)    dense bias (f32)
    # gamma_ref: (1, H)    layer-norm scale (f32)
    # beta_ref:  (1, H)    layer-norm shift (f32)
    # emb_ref:   (tv, H)   vocab tile of the embedding table, NATIVE (V, H) layout
    # vbias_ref: (1, tv)   vocab-bias tile (f32)
    # out_ref:   (tm, tv)  logits tile
    # h_ref:     (tm, H)   VMEM scratch caching dense+GELU+LN result per row tile

    # Dense + GELU + LayerNorm depend only on the row tile: compute them once
    # (first vocab step) and cache in scratch; reuse for all vocab tiles.
    # INVARIANT: this is only correct while the vocab axis (grid axis 1) is the
    # innermost, sequentially iterated ("arbitrary") axis -- see CompilerParams.
    @pl.when(pl.program_id(1) == 0)
    def _():
        x = x_ref[...]
        # x @ Wd^T : contract x dim 1 with Wd dim 1 (Wd is (out, in)).
        h = lax.dot_general(x, wd_ref[...],
                            dimension_numbers=(((1,), (1,)), ((), ())),
                            preferred_element_type=jnp.float32)
        h = h + bd_ref[...]

        # erf-form GELU (matches BERT's gelu), f32.
        inv_sqrt2 = jnp.float32(1.0 / math.sqrt(2.0))
        h = 0.5 * h * (1.0 + lax.erf(h * inv_sqrt2))

        # BERT LayerNorm over the last dim, eps=1e-12, biased variance, f32 stats.
        mean = jnp.mean(h, axis=-1, keepdims=True)
        centered = h - mean
        var = jnp.mean(centered * centered, axis=-1, keepdims=True)
        h = gamma_ref[...] * centered * lax.rsqrt(var + jnp.float32(1e-12)) + beta_ref[...]

        # Note: scratch holds LN output in compute dtype (bf16 by default);
        # use compute_dtype=f32 if stricter logits accuracy is required.
        h_ref[...] = h.astype(h_ref.dtype)

    # Vocab projection: (tm, H) x (tv, H)^T -> (tm, tv), pure MXU work,
    # consuming the embedding tile in its native layout (contract on H).
    logits = lax.dot_general(h_ref[...], emb_ref[...],
                             dimension_numbers=(((1,), (1,)), ((), ())),
                             preferred_element_type=jnp.float32)
    out_ref[...] = (logits + vbias_ref[...]).astype(out_ref.dtype)


def _make_call(M, V, H, tm_eff, tv_eff, compute_dtype, out_dtype,
               emb_buffers, single_buffer_constants, vmem_limit_bytes, cost):
    const_kwargs = (dict(pipeline_mode=pl.Buffered(1))
                    if single_buffer_constants else {})
    emb_kwargs = (dict(pipeline_mode=pl.Buffered(emb_buffers))
                  if emb_buffers != 2 else {})
    grid = (pl.cdiv(M, tm_eff), pl.cdiv(V, tv_eff))
    return pl.pallas_call(
        _masked_lm_kernel,
        out_shape=jax.ShapeDtypeStruct((M, V), out_dtype),
        grid_spec=pltpu.PrefetchScalarGridSpec(
            num_scalar_prefetch=0,
            grid=grid,
            in_specs=[
                pl.BlockSpec((tm_eff, H), lambda i, j: (i, 0)),                  # x row tile
                pl.BlockSpec((H, H), lambda i, j: (0, 0), **const_kwargs),       # dense weight
                pl.BlockSpec((1, H), lambda i, j: (0, 0), **const_kwargs),       # dense bias
                pl.BlockSpec((1, H), lambda i, j: (0, 0), **const_kwargs),       # ln gamma
                pl.BlockSpec((1, H), lambda i, j: (0, 0), **const_kwargs),       # ln beta
                pl.BlockSpec((tv_eff, H), lambda i, j: (j, 0), **emb_kwargs),    # emb vocab tile (native layout)
                pl.BlockSpec((1, tv_eff), lambda i, j: (0, j)),                  # vocab bias tile
            ],
            out_specs=pl.BlockSpec((tm_eff, tv_eff), lambda i, j: (i, j)),
            scratch_shapes=[pltpu.VMEM((tm_eff, H), compute_dtype)],
        ),
        compiler_params=pltpu.CompilerParams(
            # INVARIANT: the vocab axis must remain innermost and "arbitrary"
            # (sequential) -- the scratch-caching in the kernel reads h_ref on
            # every vocab step but only writes it at program_id(1) == 0.  Do
            # not reorder the grid or mark axis 1 "parallel"/core_parallel.
            dimension_semantics=("parallel", "arbitrary"),
            vmem_limit_bytes=vmem_limit_bytes),
        cost_estimate=cost,
    )


def masked_lm_forward(hidden_states, word_embeddings_weight,
                      dense_w, dense_b, ln_gamma, ln_beta, out_bias,
                      *, tm=512, tv=2048,
                      compute_dtype=jnp.bfloat16, out_dtype=jnp.bfloat16,
                      emb_buffers=2, single_buffer_constants=True,
                      vmem_limit_bytes=None):
    """hidden_states: (B, S, H); word_embeddings_weight: (V, H).

    Tile guidance (perf review): tm=512 on v5e, 512-1024 on v7x, 1024 on v6e;
    tv=2048 (4096 on v6e).  Logits are bf16 by default (cast in the loss if
    f32 is needed).  On v6e, if profiling still shows exposed embedding DMA,
    pass emb_buffers=3.
    """
    B, S, H = hidden_states.shape
    V = word_embeddings_weight.shape[0]
    M = B * S

    # Effective tiles: full-extent blocks for small arrays, otherwise the
    # requested tile (must satisfy the (8, 128) alignment).  No host-side
    # padding or output slicing: Pallas masks edge blocks (grid uses cdiv).
    if M > tm:
        assert tm % 8 == 0, "tm must be a multiple of 8"
        tm_eff = tm
    else:
        tm_eff = M
    if V > tv:
        assert tv % 128 == 0, "tv must be a multiple of 128"
        tv_eff = tv
    else:
        tv_eff = V

    x2d = hidden_states.reshape(M, H).astype(compute_dtype)
    wd = dense_w.astype(compute_dtype)            # native (out, in); no transpose
    # Embedding table stays in its native (V, H) layout; only cast if needed.
    # For production, pre-cast + cache the bf16 table outside the forward path
    # so this is a no-op every step.
    emb = word_embeddings_weight
    if emb.dtype != compute_dtype:
        emb = emb.astype(compute_dtype)
    bd = dense_b.reshape(1, H).astype(jnp.float32)
    gamma = ln_gamma.reshape(1, H).astype(jnp.float32)
    beta = ln_beta.reshape(1, H).astype(jnp.float32)
    vbias = out_bias.reshape(1, V).astype(jnp.float32)

    cbytes = jnp.dtype(compute_dtype).itemsize
    obytes = jnp.dtype(out_dtype).itemsize

    # VMEM footprint estimate (steady-state pipeline buffers + scratch + the
    # f32 GELU/LN temporaries live at vocab step 0), with headroom, clamped
    # below the physical VMEM of the detected chip (v7x: 64 MiB, v5e/v6e: 128).
    if vmem_limit_bytes is None:
        est = (2 * tm_eff * H * cbytes                                   # x (double buffer)
               + (1 if single_buffer_constants else 2) * H * H * cbytes  # dense weight
               + 6 * H * 4                                               # bd/gamma/beta
               + emb_buffers * tv_eff * H * cbytes                       # embedding stream
               + 2 * tv_eff * 4                                          # vocab bias tiles
               + 2 * tm_eff * tv_eff * obytes                            # logits (double buffer)
               + tm_eff * H * cbytes                                     # h scratch
               + 2 * tm_eff * H * 4)                                     # f32 temporaries at j==0
        try:
            cap = pltpu.get_tpu_info().vmem_capacity_bytes
        except Exception:
            cap = 64 * 1024 * 1024
        vmem_limit_bytes = max(32 * 1024 * 1024,
                               min(int(est * 1.25) + (8 << 20), cap - (8 << 20)))

    n_row_tiles = pl.cdiv(M, tm_eff)
    cost = pl.CostEstimate(
        flops=2 * M * H * H + 2 * M * H * V,
        transcendentals=M * H,
        bytes_accessed=(M * H * cbytes                 # activations in
                        + H * H * cbytes               # dense weight
                        + n_row_tiles * V * H * cbytes  # embedding stream (per row tile)
                        + M * V * obytes),             # logits writeback
    )

    args = (x2d, wd, bd, gamma, beta, emb, vbias)
    try:
        out = _make_call(M, V, H, tm_eff, tv_eff, compute_dtype, out_dtype,
                         emb_buffers, single_buffer_constants,
                         vmem_limit_bytes, cost)(*args)
    except Exception:
        if not single_buffer_constants:
            raise
        # Fallback: if this jax build rejects pl.Buffered(1) on the constant
        # blocks, default double-buffering is still correct (just a bit more
        # VMEM for the dense weight).
        out = _make_call(M, V, H, tm_eff, tv_eff, compute_dtype, out_dtype,
                         emb_buffers, False, vmem_limit_bytes, cost)(*args)

    return out.reshape(B, S, V)


def masked_lm_reference(hidden_states, word_embeddings_weight,
                        dense_w, dense_b, ln_gamma, ln_beta, out_bias):
    h = hidden_states @ dense_w.T + dense_b
    h = 0.5 * h * (1.0 + lax.erf(h / jnp.sqrt(2.0)))
    mean = jnp.mean(h, axis=-1, keepdims=True)
    var = jnp.mean((h - mean) ** 2, axis=-1, keepdims=True)
    h = ln_gamma * (h - mean) / jnp.sqrt(var + 1e-12) + ln_beta
    return h @ word_embeddings_weight.T + out_bias


if __name__ == "__main__":
    key = jax.random.PRNGKey(0)
    keys = jax.random.split(key, 12)

    # --- Case 1: small shapes, single-block path -----------------------------
    B, S, H, V = 2, 8, 32, 48
    hidden_states = jax.random.normal(keys[0], (B, S, H), dtype=jnp.float32)
    word_embeddings_weight = jax.random.normal(keys[1], (V, H), dtype=jnp.float32) * 0.02
    dense_w = jax.random.normal(keys[2], (H, H), dtype=jnp.float32) * 0.02   # nn.Linear weight (out, in)
    dense_b = jax.random.normal(keys[3], (H,), dtype=jnp.float32) * 0.02
    ln_gamma = jnp.ones((H,), dtype=jnp.float32)
    ln_beta = jnp.zeros((H,), dtype=jnp.float32)
    out_bias = jnp.zeros((V,), dtype=jnp.float32)

    ref = masked_lm_reference(hidden_states, word_embeddings_weight,
                              dense_w, dense_b, ln_gamma, ln_beta, out_bias)

    # 1a) f32 compute/output path: strict numerical check.
    out_f32 = masked_lm_forward(hidden_states, word_embeddings_weight,
                                dense_w, dense_b, ln_gamma, ln_beta, out_bias,
                                compute_dtype=jnp.float32, out_dtype=jnp.float32)
    out_f32 = jax.block_until_ready(out_f32)
    assert out_f32.shape == (B, S, V)
    assert jnp.allclose(out_f32, ref, atol=1e-4, rtol=1e-4)

    # 1b) default performance config (bf16 compute + bf16 logits): loose tol.
    out_bf16 = masked_lm_forward(hidden_states, word_embeddings_weight,
                                 dense_w, dense_b, ln_gamma, ln_beta, out_bias)
    out_bf16 = jax.block_until_ready(out_bf16)
    assert out_bf16.shape == (B, S, V)
    assert out_bf16.dtype == jnp.bfloat16
    assert jnp.allclose(out_bf16.astype(jnp.float32), ref, atol=5e-2, rtol=5e-2)

    # --- Case 2: shapes that do NOT divide the tiles (exercises masked edge
    # blocks: no host-side padding, no output slice) ---------------------------
    B2, S2, H2, V2 = 2, 9, 32, 200   # M=18 (not /8-tile), V=200 (not /128-tile)
    hs2 = jax.random.normal(keys[4], (B2, S2, H2), dtype=jnp.float32)
    emb2 = jax.random.normal(keys[5], (V2, H2), dtype=jnp.float32) * 0.02
    dw2 = jax.random.normal(keys[6], (H2, H2), dtype=jnp.float32) * 0.02
    db2 = jax.random.normal(keys[7], (H2,), dtype=jnp.float32) * 0.02
    g2 = jnp.ones((H2,), dtype=jnp.float32)
    b2 = jnp.zeros((H2,), dtype=jnp.float32)
    vb2 = jax.random.normal(keys[8], (V2,), dtype=jnp.float32) * 0.02

    ref2 = masked_lm_reference(hs2, emb2, dw2, db2, g2, b2, vb2)
    out2 = masked_lm_forward(hs2, emb2, dw2, db2, g2, b2, vb2,
                             tm=8, tv=128,
                             compute_dtype=jnp.float32, out_dtype=jnp.float32)
    out2 = jax.block_until_ready(out2)
    assert out2.shape == (B2, S2, V2)
    assert jnp.allclose(out2, ref2, atol=1e-4, rtol=1e-4)

    print("KERNEL_OK")
</pallas_src>

<mosaic_0001>
module attributes {stable_mosaic.version = 11 : i64} {
  func.func @_masked_lm_kernel(%arg0: i32, %arg1: i32, %arg2: memref<16x32xf32, #tpu.memory_space<vmem>>, %arg3: memref<32x32xf32, #tpu.memory_space<vmem>>, %arg4: memref<1x32xf32, #tpu.memory_space<vmem>>, %arg5: memref<1x32xf32, #tpu.memory_space<vmem>>, %arg6: memref<1x32xf32, #tpu.memory_space<vmem>>, %arg7: memref<48x32xf32, #tpu.memory_space<vmem>>, %arg8: memref<1x48xf32, #tpu.memory_space<vmem>>, %arg9: memref<16x48xf32, #tpu.memory_space<vmem>>, %arg10: memref<16x32xf32, #tpu.memory_space<vmem>>) attributes {dimension_semantics = [#tpu.dimension_semantics<parallel>, #tpu.dimension_semantics<arbitrary>], iteration_bounds = array<i64: 1, 1>, scalar_prefetch = 0 : i64, scratch_operands = 1 : i64, tpu.core_type = #tpu.core_type<tc>, window_params = [{transform_indices = @transform_0, window_bounds = array<i64: 16, 32>}, {pipeline_mode = #tpu.pipeline_mode<synchronous>, transform_indices = @transform_1, window_bounds = array<i64: 32, 32>}, {pipeline_mode = #tpu.pipeline_mode<synchronous>, transform_indices = @transform_2, window_bounds = array<i64: 1, 32>}, {pipeline_mode = #tpu.pipeline_mode<synchronous>, transform_indices = @transform_3, window_bounds = array<i64: 1, 32>}, {pipeline_mode = #tpu.pipeline_mode<synchronous>, transform_indices = @transform_4, window_bounds = array<i64: 1, 32>}, {transform_indices = @transform_5, window_bounds = array<i64: 48, 32>}, {transform_indices = @transform_6, window_bounds = array<i64: 1, 48>}, {transform_indices = @transform_7, window_bounds = array<i64: 16, 48>}]} {
    %c0_i32 = arith.constant 0 : i32
    %0 = arith.cmpi eq, %arg1, %c0_i32 : i32
    %1 = arith.extui %0 : i1 to i32
    %c0_i32_0 = arith.constant 0 : i32
    %2 = arith.cmpi ne, %1, %c0_i32_0 : i32
    scf.if %2 {
      %c0_8 = arith.constant 0 : index
      %c0_9 = arith.constant 0 : index
      %10 = vector.load %arg2[%c0_8, %c0_9] : memref<16x32xf32, #tpu.memory_space<vmem>>, vector<16x32xf32>
      %c0_10 = arith.constant 0 : index
      %c0_11 = arith.constant 0 : index
      %11 = vector.load %arg3[%c0_10, %c0_11] : memref<32x32xf32, #tpu.memory_space<vmem>>, vector<32x32xf32>
      %cst_12 = arith.constant dense<0.000000e+00> : vector<16x32xf32>
      %12 = tpu.matmul %10, %11, %cst_12 {dimension_numbers = #tpu.dot_dimension_numbers<[1], [1], [0], [0], [0, 0, 1, 0], [], []>} : vector<16x32xf32>, vector<32x32xf32>, vector<16x32xf32> -> vector<16x32xf32>
      %c0_13 = arith.constant 0 : index
      %c0_14 = arith.constant 0 : index
      %13 = vector.load %arg4[%c0_13, %c0_14] : memref<1x32xf32, #tpu.memory_space<vmem>>, vector<1x32xf32>
      %14 = vector.broadcast %13 : vector<1x32xf32> to vector<16x32xf32>
      %15 = arith.addf %12, %14 : vector<16x32xf32>
      %cst_15 = arith.constant 5.000000e-01 : f32
      %16 = vector.broadcast %cst_15 : f32 to vector<16x32xf32>
      %17 = arith.mulf %16, %15 : vector<16x32xf32>
      %cst_16 = arith.constant 0.707106769 : f32
      %18 = vector.broadcast %cst_16 : f32 to vector<16x32xf32>
      %19 = arith.mulf %15, %18 : vector<16x32xf32>
      %20 = math.erf %19 : vector<16x32xf32>
      %cst_17 = arith.constant 1.000000e+00 : f32
      %21 = vector.broadcast %cst_17 : f32 to vector<16x32xf32>
      %22 = arith.addf %21, %20 : vector<16x32xf32>
      %23 = arith.mulf %17, %22 : vector<16x32xf32>
      %cst_18 = arith.constant dense<0.000000e+00> : vector<16xf32>
      %24 = vector.multi_reduction <add>, %23, %cst_18 [1] : vector<16x32xf32> to vector<16xf32>
      %25 = vector.shape_cast %24 : vector<16xf32> to vector<16x1xf32>
      %cst_19 = arith.constant 3.200000e+01 : f32
      %26 = vector.broadcast %cst_19 : f32 to vector<16x1xf32>
      %27 = arith.divf %25, %26 : vector<16x1xf32>
      %28 = vector.broadcast %27 : vector<16x1xf32> to vector<16x32xf32>
      %29 = arith.subf %23, %28 : vector<16x32xf32>
      %30 = arith.mulf %29, %29 : vector<16x32xf32>
      %cst_20 = arith.constant dense<0.000000e+00> : vector<16xf32>
      %31 = vector.multi_reduction <add>, %30, %cst_20 [1] : vector<16x32xf32> to vector<16xf32>
      %32 = vector.shape_cast %31 : vector<16xf32> to vector<16x1xf32>
      %cst_21 = arith.constant 3.200000e+01 : f32
      %33 = vector.broadcast %cst_21 : f32 to vector<16x1xf32>
      %34 = arith.divf %32, %33 : vector<16x1xf32>
      %c0_22 = arith.constant 0 : index
      %c0_23 = arith.constant 0 : index
      %35 = vector.load %arg5[%c0_22, %c0_23] : memref<1x32xf32, #tpu.memory_space<vmem>>, vector<1x32xf32>
      %36 = vector.broadcast %35 : vector<1x32xf32> to vector<16x32xf32>
      %37 = arith.mulf %36, %29 : vector<16x32xf32>
      %cst_24 = arith.constant 9.99999996E-13 : f32
      %38 = vector.broadcast %cst_24 : f32 to vector<16x1xf32>
      %39 = arith.addf %34, %38 : vector<16x1xf32>
      %40 = math.rsqrt %39 : vector<16x1xf32>
      %41 = vector.broadcast %40 : vector<16x1xf32> to vector<16x32xf32>
      %42 = arith.mulf %37, %41 : vector<16x32xf32>
      %c0_25 = arith.constant 0 : index
      %c0_26 = arith.constant 0 : index
      %43 = vector.load %arg6[%c0_25, %c0_26] : memref<1x32xf32, #tpu.memory_space<vmem>>, vector<1x32xf32>
      %44 = vector.broadcast %43 : vector<1x32xf32> to vector<16x32xf32>
      %45 = arith.addf %42, %44 : vector<16x32xf32>
      %c0_27 = arith.constant 0 : index
      %c0_28 = arith.constant 0 : index
      %46 = vector.load %arg10[%c0_27, %c0_28] : memref<16x32xf32, #tpu.memory_space<vmem>>, vector<16x32xf32>
      tpu.vector_store %arg10[%c0_27, %c0_28], %45 {strides = array<i32>} : memref<16x32xf32, #tpu.memory_space<vmem>>, vector<16x32xf32>,
    } else {
    }
    %c0 = arith.constant 0 : index
    %c0_1 = arith.constant 0 : index
    %3 = vector.load %arg10[%c0, %c0_1] : memref<16x32xf32, #tpu.memory_space<vmem>>, vector<16x32xf32>
    %c0_2 = arith.constant 0 : index
    %c0_3 = arith.constant 0 : index
    %4 = vector.load %arg7[%c0_2, %c0_3] : memref<48x32xf32, #tpu.memory_space<vmem>>, vector<48x32xf32>
    %cst = arith.constant dense<0.000000e+00> : vector<16x48xf32>
    %5 = tpu.matmul %3, %4, %cst {dimension_numbers = #tpu.dot_dimension_numbers<[1], [1], [0], [0], [0, 0, 1, 0], [], []>} : vector<16x32xf32>, vector<48x32xf32>, vector<16x48xf32> -> vector<16x48xf32>
    %c0_4 = arith.constant 0 : index
    %c0_5 = arith.constant 0 : index
    %6 = vector.load %arg8[%c0_4, %c0_5] : memref<1x48xf32, #tpu.memory_space<vmem>>, vector<1x48xf32>
    %7 = vector.broadcast %6 : vector<1x48xf32> to vector<16x48xf32>
    %8 = arith.addf %5, %7 : vector<16x48xf32>
    %c0_6 = arith.constant 0 : index
    %c0_7 = arith.constant 0 : index
    %9 = vector.load %arg9[%c0_6, %c0_7] : memref<16x48xf32, #tpu.memory_space<vmem>>, vector<16x48xf32>
    tpu.vector_store %arg9[%c0_6, %c0_7], %8 {strides = array<i32>} : memref<16x48xf32, #tpu.memory_space<vmem>>, vector<16x48xf32>,
    return
  }
  func.func @transform_0(%arg0: i32, %arg1: i32) -> (i32, i32) {
    %c0_i32 = arith.constant 0 : i32
    %c0_i32_0 = arith.constant 0 : i32
    return %arg0, %c0_i32 : i32, i32
  }
  func.func @transform_1(%arg0: i32, %arg1: i32) -> (i32, i32) {
    %c0_i32 = arith.constant 0 : i32
    %c0_i32_0 = arith.constant 0 : i32
    %c0_i32_1 = arith.constant 0 : i32
    return %c0_i32, %c0_i32_0 : i32, i32
  }
  func.func @transform_2(%arg0: i32, %arg1: i32) -> (i32, i32) {
    %c0_i32 = arith.constant 0 : i32
    %c0_i32_0 = arith.constant 0 : i32
    %c0_i32_1 = arith.constant 0 : i32
    return %c0_i32, %c0_i32_0 : i32, i32
  }
  func.func @transform_3(%arg0: i32, %arg1: i32) -> (i32, i32) {
    %c0_i32 = arith.constant 0 : i32
    %c0_i32_0 = arith.constant 0 : i32
    %c0_i32_1 = arith.constant 0 : i32
    return %c0_i32, %c0_i32_0 : i32, i32
  }
  func.func @transform_4(%arg0: i32, %arg1: i32) -> (i32, i32) {
    %c0_i32 = arith.constant 0 : i32
    %c0_i32_0 = arith.constant 0 : i32
    %c0_i32_1 = arith.constant 0 : i32
    return %c0_i32, %c0_i32_0 : i32, i32
  }
  func.func @transform_5(%arg0: i32, %arg1: i32) -> (i32, i32) {
    %c0_i32 = arith.constant 0 : i32
    %c0_i32_0 = arith.constant 0 : i32
    return %arg1, %c0_i32 : i32, i32
  }
  func.func @transform_6(%arg0: i32, %arg1: i32) -> (i32, i32) {
    %c0_i32 = arith.constant 0 : i32
    %c0_i32_0 = arith.constant 0 : i32
    return %c0_i32, %arg1 : i32, i32
  }
  func.func @transform_7(%arg0: i32, %arg1: i32) -> (i32, i32) {
    %c0_i32 = arith.constant 0 : i32
    return %arg0, %arg1 : i32, i32
  }
}

module attributes {stable_mosaic.version = 11 : i64} {
  func.func @_masked_lm_kernel(%arg0: i32, %arg1: i32, %arg2: memref<16x32xf32, #tpu.memory_space<vmem>>, %arg3: memref<32x32xf32, #tpu.memory_space<vmem>>, %arg4: memref<1x32xf32, #tpu.memory_space<vmem>>, %arg5: memref<1x32xf32, #tpu.memory_space<vmem>>, %arg6: memref<1x32xf32, #tpu.memory_space<vmem>>, %arg7: memref<48x32xf32, #tpu.memory_space<vmem>>, %arg8: memref<1x48xf32, #tpu.memory_space<vmem>>, %arg9: memref<16x48xf32, #tpu.memory_space<vmem>>, %arg10: memref<16x32xf32, #tpu.memory_space<vmem>>) attributes {dimension_semantics = [#tpu.dimension_semantics<parallel>, #tpu.dimension_semantics<arbitrary>], iteration_bounds = array<i64: 1, 1>, scalar_prefetch = 0 : i64, scratch_operands = 1 : i64, tpu.core_type = #tpu.core_type<tc>, window_params = [{transform_indices = @transform_0, window_bounds = array<i64: 16, 32>}, {pipeline_mode = #tpu.pipeline_mode<synchronous>, transform_indices = @transform_1, window_bounds = array<i64: 32, 32>}, {pipeline_mode = #tpu.pipeline_mode<synchronous>, transform_indices = @transform_2, window_bounds = array<i64: 1, 32>}, {pipeline_mode = #tpu.pipeline_mode<synchronous>, transform_indices = @transform_3, window_bounds = array<i64: 1, 32>}, {pipeline_mode = #tpu.pipeline_mode<synchronous>, transform_indices = @transform_4, window_bounds = array<i64: 1, 32>}, {transform_indices = @transform_5, window_bounds = array<i64: 48, 32>}, {transform_indices = @transform_6, window_bounds = array<i64: 1, 48>}, {transform_indices = @transform_7, window_bounds = array<i64: 16, 48>}]} {
    %c0_i32 = arith.constant 0 : i32
    %0 = arith.cmpi eq, %arg1, %c0_i32 : i32
    %1 = arith.extui %0 : i1 to i32
    %c0_i32_0 = arith.constant 0 : i32
    %2 = arith.cmpi ne, %1, %c0_i32_0 : i32
    scf.if %2 {
      %c0_8 = arith.constant 0 : index
      %c0_9 = arith.constant 0 : index
      %10 = vector.load %arg2[%c0_8, %c0_9] : memref<16x32xf32, #tpu.memory_space<vmem>>, vector<16x32xf32>
      %c0_10 = arith.constant 0 : index
      %c0_11 = arith.constant 0 : index
      %11 = vector.load %arg3[%c0_10, %c0_11] : memref<32x32xf32, #tpu.memory_space<vmem>>, vector<32x32xf32>
      %cst_12 = arith.constant dense<0.000000e+00> : vector<16x32xf32>
      %12 = tpu.matmul %10, %11, %cst_12 {dimension_numbers = #tpu.dot_dimension_numbers<[1], [1], [0], [0], [0, 0, 1, 0], [], []>} : vector<16x32xf32>, vector<32x32xf32>, vector<16x32xf32> -> vector<16x32xf32>
      %c0_13 = arith.constant 0 : index
      %c0_14 = arith.constant 0 : index
      %13 = vector.load %arg4[%c0_13, %c0_14] : memref<1x32xf32, #tpu.memory_space<vmem>>, vector<1x32xf32>
      %14 = vector.broadcast %13 : vector<1x32xf32> to vector<16x32xf32>
      %15 = arith.addf %12, %14 : vector<16x32xf32>
      %cst_15 = arith.constant 5.000000e-01 : f32
      %16 = vector.broadcast %cst_15 : f32 to vector<16x32xf32>
      %17 = arith.mulf %16, %15 : vector<16x32xf32>
      %cst_16 = arith.constant 0.707106769 : f32
      %18 = vector.broadcast %cst_16 : f32 to vector<16x32xf32>
      %19 = arith.mulf %15, %18 : vector<16x32xf32>
      %20 = math.erf %19 : vector<16x32xf32>
      %cst_17 = arith.constant 1.000000e+00 : f32
      %21 = vector.broadcast %cst_17 : f32 to vector<16x32xf32>
      %22 = arith.addf %21, %20 : vector<16x32xf32>
      %23 = arith.mulf %17, %22 : vector<16x32xf32>
      %cst_18 = arith.constant dense<0.000000e+00> : vector<16xf32>
      %24 = vector.multi_reduction <add>, %23, %cst_18 [1] : vector<16x32xf32> to vector<16xf32>
      %25 = vector.shape_cast %24 : vector<16xf32> to vector<16x1xf32>
      %cst_19 = arith.constant 3.200000e+01 : f32
      %26 = vector.broadcast %cst_19 : f32 to vector<16x1xf32>
      %27 = arith.divf %25, %26 : vector<16x1xf32>
      %28 = vector.broadcast %27 : vector<16x1xf32> to vector<16x32xf32>
      %29 = arith.subf %23, %28 : vector<16x32xf32>
      %30 = arith.mulf %29, %29 : vector<16x32xf32>
      %cst_20 = arith.constant dense<0.000000e+00> : vector<16xf32>
      %31 = vector.multi_reduction <add>, %30, %cst_20 [1] : vector<16x32xf32> to vector<16xf32>
      %32 = vector.shape_cast %31 : vector<16xf32> to vector<16x1xf32>
      %cst_21 = arith.constant 3.200000e+01 : f32
      %33 = vector.broadcast %cst_21 : f32 to vector<16x1xf32>
      %34 = arith.divf %32, %33 : vector<16x1xf32>
      %c0_22 = arith.constant 0 : index
      %c0_23 = arith.constant 0 : index
      %35 = vector.load %arg5[%c0_22, %c0_23] : memref<1x32xf32, #tpu.memory_space<vmem>>, vector<1x32xf32>
      %36 = vector.broadcast %35 : vector<1x32xf32> to vector<16x32xf32>
      %37 = arith.mulf %36, %29 : vector<16x32xf32>
      %cst_24 = arith.constant 9.99999996E-13 : f32
      %38 = vector.broadcast %cst_24 : f32 to vector<16x1xf32>
      %39 = arith.addf %34, %38 : vector<16x1xf32>
      %40 = math.rsqrt %39 : vector<16x1xf32>
      %41 = vector.broadcast %40 : vector<16x1xf32> to vector<16x32xf32>
      %42 = arith.mulf %37, %41 : vector<16x32xf32>
      %c0_25 = arith.constant 0 : index
      %c0_26 = arith.constant 0 : index
      %43 = vector.load %arg6[%c0_25, %c0_26] : memref<1x32xf32, #tpu.memory_space<vmem>>, vector<1x32xf32>
      %44 = vector.broadcast %43 : vector<1x32xf32> to vector<16x32xf32>
      %45 = arith.addf %42, %44 : vector<16x32xf32>
      %c0_27 = arith.constant 0 : index
      %c0_28 = arith.constant 0 : index
      %46 = vector.load %arg10[%c0_27, %c0_28] : memref<16x32xf32, #tpu.memory_space<vmem>>, vector<16x32xf32>
      tpu.vector_store %arg10[%c0_27, %c0_28], %45 {strides = array<i32>} : memref<16x32xf32, #tpu.memory_space<vmem>>, vector<16x32xf32>,
    } else {
    }
    %c0 = arith.constant 0 : index
    %c0_1 = arith.constant 0 : index
    %3 = vector.load %arg10[%c0, %c0_1] : memref<16x32xf32, #tpu.memory_space<vmem>>, vector<16x32xf32>
    %c0_2 = arith.constant 0 : index
    %c0_3 = arith.constant 0 : index
    %4 = vector.load %arg7[%c0_2, %c0_3] : memref<48x32xf32, #tpu.memory_space<vmem>>, vector<48x32xf32>
    %cst = arith.constant dense<0.000000e+00> : vector<16x48xf32>
    %5 = tpu.matmul %3, %4, %cst {dimension_numbers = #tpu.dot_dimension_numbers<[1], [1], [0], [0], [0, 0, 1, 0], [], []>} : vector<16x32xf32>, vector<48x32xf32>, vector<16x48xf32> -> vector<16x48xf32>
    %c0_4 = arith.constant 0 : index
    %c0_5 = arith.constant 0 : index
    %6 = vector.load %arg8[%c0_4, %c0_5] : memref<1x48xf32, #tpu.memory_space<vmem>>, vector<1x48xf32>
    %7 = vector.broadcast %6 : vector<1x48xf32> to vector<16x48xf32>
    %8 = arith.addf %5, %7 : vector<16x48xf32>
    %c0_6 = arith.constant 0 : index
    %c0_7 = arith.constant 0 : index
    %9 = vector.load %arg9[%c0_6, %c0_7] : memref<16x48xf32, #tpu.memory_space<vmem>>, vector<16x48xf32>
    tpu.vector_store %arg9[%c0_6, %c0_7], %8 {strides = array<i32>} : memref<16x48xf32, #tpu.memory_space<vmem>>, vector<16x48xf32>,
    return
  }
  func.func @transform_0(%arg0: i32, %arg1: i32) -> (i32, i32) {
    %c0_i32 = arith.constant 0 : i32
    %c0_i32_0 = arith.constant 0 : i32
    return %arg0, %c0_i32 : i32, i32
  }
  func.func @transform_1(%arg0: i32, %arg1: i32) -> (i32, i32) {
    %c0_i32 = arith.constant 0 : i32
    %c0_i32_0 = arith.constant 0 : i32
    %c0_i32_1 = arith.constant 0 : i32
    return %c0_i32, %c0_i32_0 : i32, i32
  }
  func.func @transform_2(%arg0: i32, %arg1: i32) -> (i32, i32) {
    %c0_i32 = arith.constant 0 : i32
    %c0_i32_0 = arith.constant 0 : i32
    %c0_i32_1 = arith.constant 0 : i32
    return %c0_i32, %c0_i32_0 : i32, i32
  }
  func.func @transform_3(%arg0: i32, %arg1: i32) -> (i32, i32) {
    %c0_i32 = arith.constant 0 : i32
    %c0_i32_0 = arith.constant 0 : i32
    %c0_i32_1 = arith.constant 0 : i32
    return %c0_i32, %c0_i32_0 : i32, i32
  }
  func.func @transform_4(%arg0: i32, %arg1: i32) -> (i32, i32) {
    %c0_i32 = arith.constant 0 : i32
    %c0_i32_0 = arith.constant 0 : i32
    %c0_i32_1 = arith.constant 0 : i32
    return %c0_i32, %c0_i32_0 : i32, i32
  }
  func.func @transform_5(%arg0: i32, %arg1: i32) -> (i32, i32) {
    %c0_i32 = arith.constant 0 : i32
    %c0_i32_0 = arith.constant 0 : i32
    return %arg1, %c0_i32 : i32, i32
  }
  func.func @transform_6(%arg0: i32, %arg1: i32) -> (i32, i32) {
    %c0_i32 = arith.constant 0 : i32
    %c0_i32_0 = arith.constant 0 : i32
    return %c0_i32, %arg1 : i32, i32
  }
  func.func @transform_7(%arg0: i32, %arg1: i32) -> (i32, i32) {
    %c0_i32 = arith.constant 0 : i32
    return %arg0, %arg1 : i32, i32
  }
}

</mosaic_0001>

<bundles_post_ra>
// kernel: tpu_custom_call.1
= control target key start
LH: loop header
LB: loop body
LE: loop exit
PB: predicated region body
PF: predicated region fallthrough
CT: control target
= control target key end

     0   :  { %vm44_vm0 = vcmask 261120   ;;  %s591_s0 = inlined_call_operand.vmem [shape: f32[16,32], index: 0, kind: input, shape index: {}]   ;;  %s592_s1 = inlined_call_operand.vmem [shape: f32[32,32], index: 1, kind: input, shape index: {}]   ;;  %s593_s2 = inlined_call_operand.vmem [shape: f32[1,32], index: 2, kind: input, shape index: {}]   ;;  %s594_s3 = inlined_call_operand.vmem [shape: f32[1,32], index: 3, kind: input, shape index: {}]   ;;  %s595_s4 = inlined_call_operand.vmem [shape: f32[1,32], index: 4, kind: input, shape index: {}]   ;;  %s596_s5 = inlined_call_operand.vmem [shape: f32[48,32], index: 5, kind: input, shape index: {}]   ;;  %s597_s6 = inlined_call_operand.vmem [shape: f32[1,48], index: 6, kind: input, shape index: {}]   ;;  %s598_s7 = inlined_call_operand.hbm [shape: f32[16,48], index: 7, kind: output, shape index: {}]  }
   0x1   :  { %v33_v0 = vld [vmem:[%s592_s1] sm:$0xff]  ;;  %v34_v1 = vld [vmem:[%s592_s1 + $0x8] sm:$0xff]  ;;  %v35_v2 = vld [vmem:[%s592_s1 + $0x10] sm:$0xff] }
   0x2   :  { %v387_v3 = vpack.c.bf16 %v34_v1, %v33_v0  ;;  %vm506_vm1 = vmpackc.low %vm44_vm0, %vm44_vm0  ;;  %v36_v5 = vld [vmem:[%s592_s1 + $0x18] sm:$0xff]  ;;  %v31_v6 = vld [vmem:[%s591_s0] sm:$0xff] }
   0x3   :  { %v393_v7 = vpack.c.bf16 %v36_v5, %v35_v2  ;;  %369 = vmatprep.mubr.msk.f32.mxu0 %vm44_vm0, %v31_v6 }
   0x4   :  { %12 = vsyncpa [#allocation4], 0  ;;  %389 = vmatprep.subr.msk.bf16.mxu0 %vm506_vm1, %v387_v3  ;;  %v32_v8 = vld [vmem:[%s591_s0 + $0x8] sm:$0xff]  ;;  %v329_v9 = vld [vmem:[%s593_s2] ss:$0 sm:$0xff]  ;;  %vm310_vm2 = vcmask 392192  }
   0x5   :  { %392 = vmatpush3.bf16.xpose.msk.msra.mxu0 %vm506_vm1, %v387_v3  ;;  %v197_v36 = vld [vmem:[%s596_s5] sm:$0xff]  ;;  %v198_v37 = vld [vmem:[%s596_s5 + $0x8] sm:$0xff]  ;;  %v199_v39 = vld [vmem:[%s596_s5 + $0x10] sm:$0xff] }
   0x6   :  { %395 = vmatprep.subr.msk.bf16.mxu0 %vm506_vm1, %v393_v7  ;;  %v399_v38 = vpack.c.bf16 %v198_v37, %v197_v36  ;;  %v200_v40 = vld [vmem:[%s596_s5 + $0x18] sm:$0xff]  ;;  %v201_v42 = vld [vmem:[%s596_s5 + $0x20] sm:$0xff]  ;;  %v202_v43 = vld [vmem:[%s596_s5 + $0x28] sm:$0xff] }
   0x7   :  { %v405_v41 = vpack.c.bf16 %v200_v40, %v199_v39  ;;  %v411_v44 = vpack.c.bf16 %v202_v43, %v201_v42  ;;  %v336_v51 = vld [vmem:[%s594_s3] ss:$0 sm:$0xff] }
   0x8   :  { %401 = vmatprep.subr.msk.bf16.mxu1 %vm506_vm1, %v399_v38  ;;  %v337_v54 = vld [vmem:[%s595_s4] ss:$0 sm:$0xff]  ;;  %s452_s4 = smov [#allocation3]  }
   0x9   :  { %404 = vmatpush3.bf16.xpose.msk.msra.mxu1 %vm506_vm1, %v399_v38  ;;  %v338_v63 = vld [vmem:[%s597_s6] ss:$0 sm:$0xff]  ;;  %s318_s28 = sshll.u32 %s452_s4, 4  ;;  %s319_s28 = int_to_ptr.vmem [resolvable:$true] %s318_s28 }
   0xa   :  { %407 = vmatprep.subr.msk.bf16.mxu1 %vm506_vm1, %v405_v41  ;;  %s428_s29 = scalar_lea.vmem %s319_s28, 256  ;;  %p433_p1 = scmp.lt.s32.totalorder %s319_s28, %s319_s28 }
   0xb   :  { %p429_p0 = scmp.ne.s32.totalorder %s319_s28, %s428_s29  ;;  %p434_p2 = scmp.lt.s32.totalorder %s428_s29, %s428_s29 }
   0xd   :  { %398 = vmatpush3.bf16.xpose.msk.msra.mxu0 %vm506_vm1, %v393_v7  ;;  %p435_p3 = por %p434_p2, %p433_p1 }
   0xf   :  { %p436_p4 = pnand %p435_p3, %p429_p0 }
  0x11   :  { %410 = vmatpush3.bf16.xpose.msk.msra.mxu1 %vm506_vm1, %v405_v41 }
  0x12   :  { %413 = vmatprep.subr.msk.bf16.mxu1 %vm506_vm1, %v411_v44 }
  0x14   :  { %370 = vmatmul.mubr.msk.f32.vlgmr.msra.gmra.mrb[0].mxu0 %vm44_vm0, %v32_v8 }
  0x19   :  { %416 = vmatpush3.bf16.xpose.msk.msra.mxu1 %vm506_vm1, %v411_v44 }
  0xe7   :  { %v371_v10 = vpop.f32.mrb[0].mxu0 }
  0xe8   :  { %v135_v11 = vadd.f32 %v371_v10, %v329_v9  ;;  %v129_v12 = vpop.f32.mrb[1].mxu0 }
  0xe9   :  { %v130_v13 = vadd.f32 %v329_v9, %v129_v12 }
  0xea   :  { %v141_v14 = vmul.f32 0.70710677, %v135_v11  ;;  %v139_v21 = vmul.f32 0.5, %v135_v11 }
  0xeb   :  { %v140_v15 = vmul.f32 0.70710677, %v130_v13  ;;  %v138_v18 = vmul.f32 0.5, %v130_v13 }
  0xec   :  { %420 = verf.f32 %v141_v14 }
  0xed   :  { %422 = verf.f32 %v140_v15 }
  0xf6   :  { %v421_v16 = vpop.eup %420 }
  0xf7   :  { %v423_v17 = vpop.eup %422  ;;  %v145_v20 = vadd.f32 1.0, %v421_v16 }
  0xf8   :  { %v144_v19 = vadd.f32 1.0, %v423_v17 }
  0xf9   :  { %v147_v24 = vmul.f32 %v145_v20, %v139_v21 }
  0xfa   :  { %v146_v22 = vmul.f32 %v144_v19, %v138_v18 }
  0xfb   :  { %v151_v25 = vsel %vm44_vm0, %v147_v24, 0.0 }
  0xfc   :  { %v148_v23 = vsel %vm44_vm0, %v146_v22, 0.0 }
  0xfd   :  { %149 = vadd.xlane.f32.xlu0 %v148_v23 }
 0x101   :  { %152 = vadd.xlane.f32.xlu0 %v151_v25 }
 0x18a   :  { %v150_v26 = vpop.xlane.xlu0 %149 }
 0x18b   :  { %v155_v27 = vmul.f32 0.03125, %v150_v26 }
 0x18d   :  { %v157_v28 = vsub.f32 %v146_v22, %v155_v27 }
 0x18e   :  { %v153_v29 = vpop.xlane.xlu0 %152 }
 0x18f   :  { %v156_v30 = vmul.f32 0.03125, %v153_v29  ;;  %v159_v31 = vmul.f32 %v157_v28, %v157_v28  ;;  %v176_v52 = vmul.f32 %v336_v51, %v157_v28 }
 0x191   :  { %v158_v32 = vsub.f32 %v147_v24, %v156_v30  ;;  %v161_v33 = vsel %vm44_vm0, %v159_v31, 0.0 }
 0x192   :  { %162 = vadd.xlane.f32.xlu1 %v161_v33 }
 0x193   :  { %v160_v34 = vmul.f32 %v158_v32, %v158_v32  ;;  %v177_v56 = vmul.f32 %v336_v51, %v158_v32 }
 0x195   :  { %v164_v35 = vsel %vm44_vm0, %v160_v34, 0.0 }
 0x196   :  { %165 = vadd.xlane.f32.xlu1 %v164_v35 }
 0x21f   :  { %v163_v45 = vpop.xlane.xlu1 %162 }
 0x220   :  { %v167_v46 = vmul.f32 0.03125, %v163_v45 }
 0x222   :  { %v178_v47 = vadd.f32 1e-12, %v167_v46 }
 0x223   :  { %v166_v48 = vpop.xlane.xlu1 %165 }
 0x224   :  { %424 = vrsqrt.f32 %v178_v47  ;;  %v168_v49 = vmul.f32 0.03125, %v166_v48 }
 0x226   :  { %v179_v50 = vadd.f32 1e-12, %v168_v49 }
 0x228   :  { %426 = vrsqrt.f32 %v179_v50 }
 0x22e   :  { %v425_v53 = vpop.eup %424 }
 0x22f   :  { %v182_v55 = vmul.f32 %v425_v53, %v176_v52 }
 0x231   :  { %v191_v57 = vadd.f32 %v337_v54, %v182_v55 }
 0x232   :  { %v427_v58 = vpop.eup %426 }
 0x233   :  { %193 = vst.msk [vmem:[#allocation2] sm:$0xff] %vm44_vm0, %v191_v57  ;;  %v183_v59 = vmul.f32 %v427_v58, %v177_v56 }
 0x235   :  { %v192_v60 = vadd.f32 %v337_v54, %v183_v59 }
 0x237   :  { %194 = vst.msk [vmem:[#allocation2 + $0x8] sm:$0xff] %vm44_vm0, %v192_v60 }
 0x23a   :  { %v195_v61 = vld [vmem:[#allocation2] sm:$0xff] }
 0x23b   :  { %384 = vmatprep.mubr.msk.f32.mxu1 %vm44_vm0, %v195_v61 }
 0x23e   :  { %v196_v62 = vld [vmem:[#allocation2 + $0x8] sm:$0xff] }
 0x23f   :  { %385 = vmatmul.mubr.msk.f32.vlgmr.msra.gmra.mrb[0].mxu1 %vm44_vm0, %v196_v62 }
 0x312   :  { %v386_v0 = vpop.f32.mrb[0].mxu1 }
 0x313   :  { %v307_v1 = vadd.f32 %v386_v0, %v338_v63  ;;  %v301_v2 = vpop.f32.mrb[1].mxu1 }
 0x314   :  { %v302_v3 = vadd.f32 %v338_v63, %v301_v2 }
 0x315   :  { %312 = vst.msk [vmem:[#allocation3 + $0x8] sm:$0xff] %vm310_vm2, %v307_v1 }
 0x316   :  { %311 = vst.msk [vmem:[#allocation3] sm:$0xff] %vm310_vm2, %v302_v3 }
 0x317   :  { %439 = shalt.err (!%p436_p4)
}
 0x318   :  { %s440_s6 = scalar_lea.hbm %s598_s7, 256 }
 0x319   :  { %p441_p5 = scmp.ne.s32.totalorder %s598_s7, %s440_s6  ;;  %p444_p6 = scmp.lt.u32.totalorder %s440_s6, %s598_s7 }
 0x31b   :  { %p446_p7 = pnand %p444_p6, %p441_p5 }
 0x31d   :  { %449 = shalt.err (!%p446_p7)
}
 0x31e   :  { %s453_s12 = smov 128   ;;  %s454_s13 = smov 8  }
 0x31f   :  { %324 = dma.vmem_to_hbm [thread:$0]  %s319_s28, 256, %s598_s7, [#allocation4], %s453_s12, %s453_s12, %s454_s13  }
 0x320   :  { %450 = dma.done.wait [#allocation4], 256  }
 0x321   :  { %451 = vsyncadd [#allocation4], 4294967040 }
 0x322   :  { %328 = vsyncpa [#allocation4], 1 }

// kernel: tpu_custom_call.1
= control target key start
LH: loop header
LB: loop body
LE: loop exit
PB: predicated region body
PF: predicated region fallthrough
CT: control target
= control target key end

     0   :  { %vm44_vm0 = vcmask 261120   ;;  %s591_s0 = inlined_call_operand.vmem [shape: f32[16,32], index: 0, kind: input, shape index: {}]   ;;  %s592_s1 = inlined_call_operand.vmem [shape: f32[32,32], index: 1, kind: input, shape index: {}]   ;;  %s593_s2 = inlined_call_operand.vmem [shape: f32[1,32], index: 2, kind: input, shape index: {}]   ;;  %s594_s3 = inlined_call_operand.vmem [shape: f32[1,32], index: 3, kind: input, shape index: {}]   ;;  %s595_s4 = inlined_call_operand.vmem [shape: f32[1,32], index: 4, kind: input, shape index: {}]   ;;  %s596_s5 = inlined_call_operand.vmem [shape: f32[48,32], index: 5, kind: input, shape index: {}]   ;;  %s597_s6 = inlined_call_operand.vmem [shape: f32[1,48], index: 6, kind: input, shape index: {}]   ;;  %s598_s7 = inlined_call_operand.hbm [shape: f32[16,48], index: 7, kind: output, shape index: {}]  }
   0x1   :  { %v33_v0 = vld [vmem:[%s592_s1] sm:$0xff]  ;;  %v34_v1 = vld [vmem:[%s592_s1 + $0x8] sm:$0xff]  ;;  %v35_v2 = vld [vmem:[%s592_s1 + $0x10] sm:$0xff] }
   0x2   :  { %v387_v3 = vpack.c.bf16 %v34_v1, %v33_v0  ;;  %vm506_vm1 = vmpackc.low %vm44_vm0, %vm44_vm0  ;;  %v36_v5 = vld [vmem:[%s592_s1 + $0x18] sm:$0xff]  ;;  %v31_v6 = vld [vmem:[%s591_s0] sm:$0xff] }
   0x3   :  { %v393_v7 = vpack.c.bf16 %v36_v5, %v35_v2  ;;  %369 = vmatprep.mubr.msk.f32.mxu0 %vm44_vm0, %v31_v6 }
   0x4   :  { %12 = vsyncpa [#allocation4], 0  ;;  %389 = vmatprep.subr.msk.bf16.mxu0 %vm506_vm1, %v387_v3  ;;  %v32_v8 = vld [vmem:[%s591_s0 + $0x8] sm:$0xff]  ;;  %v329_v9 = vld [vmem:[%s593_s2] ss:$0 sm:$0xff]  ;;  %vm310_vm2 = vcmask 392192  }
   0x5   :  { %392 = vmatpush3.bf16.xpose.msk.msra.mxu0 %vm506_vm1, %v387_v3  ;;  %v197_v36 = vld [vmem:[%s596_s5] sm:$0xff]  ;;  %v198_v37 = vld [vmem:[%s596_s5 + $0x8] sm:$0xff]  ;;  %v199_v39 = vld [vmem:[%s596_s5 + $0x10] sm:$0xff] }
   0x6   :  { %395 = vmatprep.subr.msk.bf16.mxu0 %vm506_vm1, %v393_v7  ;;  %v399_v38 = vpack.c.bf16 %v198_v37, %v197_v36  ;;  %v200_v40 = vld [vmem:[%s596_s5 + $0x18] sm:$0xff]  ;;  %v201_v42 = vld [vmem:[%s596_s5 + $0x20] sm:$0xff]  ;;  %v202_v43 = vld [vmem:[%s596_s5 + $0x28] sm:$0xff] }
   0x7   :  { %v405_v41 = vpack.c.bf16 %v200_v40, %v199_v39  ;;  %v411_v44 = vpack.c.bf16 %v202_v43, %v201_v42  ;;  %v336_v51 = vld [vmem:[%s594_s3] ss:$0 sm:$0xff] }
   0x8   :  { %401 = vmatprep.subr.msk.bf16.mxu1 %vm506_vm1, %v399_v38  ;;  %v337_v54 = vld [vmem:[%s595_s4] ss:$0 sm:$0xff]  ;;  %s452_s4 = smov [#allocation3]  }
   0x9   :  { %404 = vmatpush3.bf16.xpose.msk.msra.mxu1 %vm506_vm1, %v399_v38  ;;  %v338_v63 = vld [vmem:[%s597_s6] ss:$0 sm:$0xff]  ;;  %s318_s28 = sshll.u32 %s452_s4, 4  ;;  %s319_s28 = int_to_ptr.vmem [resolvable:$true] %s318_s28 }
   0xa   :  { %407 = vmatprep.subr.msk.bf16.mxu1 %vm506_vm1, %v405_v41  ;;  %s428_s29 = scalar_lea.vmem %s319_s28, 256  ;;  %p433_p1 = scmp.lt.s32.totalorder %s319_s28, %s319_s28 }
   0xb   :  { %p429_p0 = scmp.ne.s32.totalorder %s319_s28, %s428_s29  ;;  %p434_p2 = scmp.lt.s32.totalorder %s428_s29, %s428_s29 }
   0xd   :  { %398 = vmatpush3.bf16.xpose.msk.msra.mxu0 %vm506_vm1, %v393_v7  ;;  %p435_p3 = por %p434_p2, %p433_p1 }
   0xf   :  { %p436_p4 = pnand %p435_p3, %p429_p0 }
  0x11   :  { %410 = vmatpush3.bf16.xpose.msk.msra.mxu1 %vm506_vm1, %v405_v41 }
  0x12   :  { %413 = vmatprep.subr.msk.bf16.mxu1 %vm506_vm1, %v411_v44 }
  0x14   :  { %370 = vmatmul.mubr.msk.f32.vlgmr.msra.gmra.mrb[0].mxu0 %vm44_vm0, %v32_v8 }
  0x19   :  { %416 = vmatpush3.bf16.xpose.msk.msra.mxu1 %vm506_vm1, %v411_v44 }
  0xe7   :  { %v371_v10 = vpop.f32.mrb[0].mxu0 }
  0xe8   :  { %v135_v11 = vadd.f32 %v371_v10, %v329_v9  ;;  %v129_v12 = vpop.f32.mrb[1].mxu0 }
  0xe9   :  { %v130_v13 = vadd.f32 %v329_v9, %v129_v12 }
  0xea   :  { %v141_v14 = vmul.f32 0.70710677, %v135_v11  ;;  %v139_v21 = vmul.f32 0.5, %v135_v11 }
  0xeb   :  { %v140_v15 = vmul.f32 0.70710677, %v130_v13  ;;  %v138_v18 = vmul.f32 0.5, %v130_v13 }
  0xec   :  { %420 = verf.f32 %v141_v14 }
  0xed   :  { %422 = verf.f32 %v140_v15 }
  0xf6   :  { %v421_v16 = vpop.eup %420 }
  0xf7   :  { %v423_v17 = vpop.eup %422  ;;  %v145_v20 = vadd.f32 1.0, %v421_v16 }
  0xf8   :  { %v144_v19 = vadd.f32 1.0, %v423_v17 }
  0xf9   :  { %v147_v24 = vmul.f32 %v145_v20, %v139_v21 }
  0xfa   :  { %v146_v22 = vmul.f32 %v144_v19, %v138_v18 }
  0xfb   :  { %v151_v25 = vsel %vm44_vm0, %v147_v24, 0.0 }
  0xfc   :  { %v148_v23 = vsel %vm44_vm0, %v146_v22, 0.0 }
  0xfd   :  { %149 = vadd.xlane.f32.xlu0 %v148_v23 }
 0x101   :  { %152 = vadd.xlane.f32.xlu0 %v151_v25 }
 0x18a   :  { %v150_v26 = vpop.xlane.xlu0 %149 }
 0x18b   :  { %v155_v27 = vmul.f32 0.03125, %v150_v26 }
 0x18d   :  { %v157_v28 = vsub.f32 %v146_v22, %v155_v27 }
 0x18e   :  { %v153_v29 = vpop.xlane.xlu0 %152 }
 0x18f   :  { %v156_v30 = vmul.f32 0.03125, %v153_v29  ;;  %v159_v31 = vmul.f32 %v157_v28, %v157_v28  ;;  %v176_v52 = vmul.f32 %v336_v51, %v157_v28 }
 0x191   :  { %v158_v32 = vsub.f32 %v147_v24, %v156_v30  ;;  %v161_v33 = vsel %vm44_vm0, %v159_v31, 0.0 }
 0x192   :  { %162 = vadd.xlane.f32.xlu1 %v161_v33 }
 0x193   :  { %v160_v34 = vmul.f32 %v158_v32, %v158_v32  ;;  %v177_v56 = vmul.f32 %v336_v51, %v158_v32 }
 0x195   :  { %v164_v35 = vsel %vm44_vm0, %v160_v34, 0.0 }
 0x196   :  { %165 = vadd.xlane.f32.xlu1 %v164_v35 }
 0x21f   :  { %v163_v45 = vpop.xlane.xlu1 %162 }
 0x220   :  { %v167_v46 = vmul.f32 0.03125, %v163_v45 }
 0x222   :  { %v178_v47 = vadd.f32 1e-12, %v167_v46 }
 0x223   :  { %v166_v48 = vpop.xlane.xlu1 %165 }
 0x224   :  { %424 = vrsqrt.f32 %v178_v47  ;;  %v168_v49 = vmul.f32 0.03125, %v166_v48 }
 0x226   :  { %v179_v50 = vadd.f32 1e-12, %v168_v49 }
 0x228   :  { %426 = vrsqrt.f32 %v179_v50 }
 0x22e   :  { %v425_v53 = vpop.eup %424 }
 0x22f   :  { %v182_v55 = vmul.f32 %v425_v53, %v176_v52 }
 0x231   :  { %v191_v57 = vadd.f32 %v337_v54, %v182_v55 }
 0x232   :  { %v427_v58 = vpop.eup %426 }
 0x233   :  { %193 = vst.msk [vmem:[#allocation2] sm:$0xff] %vm44_vm0, %v191_v57  ;;  %v183_v59 = vmul.f32 %v427_v58, %v177_v56 }
 0x235   :  { %v192_v60 = vadd.f32 %v337_v54, %v183_v59 }
 0x237   :  { %194 = vst.msk [vmem:[#allocation2 + $0x8] sm:$0xff] %vm44_vm0, %v192_v60 }
 0x23a   :  { %v195_v61 = vld [vmem:[#allocation2] sm:$0xff] }
 0x23b   :  { %384 = vmatprep.mubr.msk.f32.mxu1 %vm44_vm0, %v195_v61 }
 0x23e   :  { %v196_v62 = vld [vmem:[#allocation2 + $0x8] sm:$0xff] }
 0x23f   :  { %385 = vmatmul.mubr.msk.f32.vlgmr.msra.gmra.mrb[0].mxu1 %vm44_vm0, %v196_v62 }
 0x312   :  { %v386_v0 = vpop.f32.mrb[0].mxu1 }
 0x313   :  { %v307_v1 = vadd.f32 %v386_v0, %v338_v63  ;;  %v301_v2 = vpop.f32.mrb[1].mxu1 }
 0x314   :  { %v302_v3 = vadd.f32 %v338_v63, %v301_v2 }
 0x315   :  { %312 = vst.msk [vmem:[#allocation3 + $0x8] sm:$0xff] %vm310_vm2, %v307_v1 }
 0x316   :  { %311 = vst.msk [vmem:[#allocation3] sm:$0xff] %vm310_vm2, %v302_v3 }
 0x317   :  { %439 = shalt.err (!%p436_p4)
}
 0x318   :  { %s440_s6 = scalar_lea.hbm %s598_s7, 256 }
 0x319   :  { %p441_p5 = scmp.ne.s32.totalorder %s598_s7, %s440_s6  ;;  %p444_p6 = scmp.lt.u32.totalorder %s440_s6, %s598_s7 }
 0x31b   :  { %p446_p7 = pnand %p444_p6, %p441_p5 }
 0x31d   :  { %449 = shalt.err (!%p446_p7)
}
 0x31e   :  { %s453_s12 = smov 128   ;;  %s454_s13 = smov 8  }
 0x31f   :  { %324 = dma.vmem_to_hbm [thread:$0]  %s319_s28, 256, %s598_s7, [#allocation4], %s453_s12, %s453_s12, %s454_s13  }
 0x320   :  { %450 = dma.done.wait [#allocation4], 256  }
 0x321   :  { %451 = vsyncadd [#allocation4], 4294967040 }
 0x322   :  { %328 = vsyncpa [#allocation4], 1 }

</bundles_post_ra>
